<compile_context>
chip_gen: v5e
topology: v5e:2x2
jax: 0.10.0
libtpu: 0.0.40
codegen_flags: <defaults>
</compile_context>

<pallas_src>
import math
import functools

import jax
import jax.numpy as jnp
from jax import lax
from jax.experimental import pallas as pl
from jax.experimental.pallas import tpu as pltpu

_SQRT2 = math.sqrt(2.0)
# [M, K] x [N, K] -> [M, N]  (contract last dim of both; MXU handles this natively)
_CONTRACT_LAST = (((1,), (1,)), ((), ()))


def _cond_equal_linear_kernel(x_ref, w_ref, l_ref, b_ref, o_ref, *,
                              scale_w, scale_b_lr, activation):
    # x_ref: (tm, in_dim)    w_ref: (tn, in_dim)   [PyTorch layout, no transpose]
    # l_ref: (tm, embed_dim) b_ref: (tn, embed_dim)
    # o_ref: (tm, tn)
    acc = lax.dot_general(x_ref[...], w_ref[...], _CONTRACT_LAST,
                          preferred_element_type=jnp.float32) * scale_w
    acc = acc + lax.dot_general(l_ref[...], b_ref[...], _CONTRACT_LAST,
                                preferred_element_type=jnp.float32) * scale_b_lr
    if activation:
        # fused_leaky_relu with bias=None: leaky_relu(x, 0.2) * sqrt(2)
        acc = jnp.where(acc >= 0.0, acc, 0.2 * acc) * _SQRT2
    o_ref[...] = acc.astype(o_ref.dtype)


def _equal_linear_nobias_kernel(x_ref, w_ref, o_ref, *, scale_w, activation):
    acc = lax.dot_general(x_ref[...], w_ref[...], _CONTRACT_LAST,
                          preferred_element_type=jnp.float32) * scale_w
    if activation:
        acc = jnp.where(acc >= 0.0, acc, 0.2 * acc) * _SQRT2
    o_ref[...] = acc.astype(o_ref.dtype)


def _pick_tm(b, tm):
    tm = max(8, (tm // 8) * 8)
    if b <= tm:
        return b          # full-dim block is always legal
    return tm             # multiple of 8; partial last block is handled by Pallas


def _pick_tn(n, tn):
    if n % 128 == 0:
        return min(tn - tn % 128 if tn >= 128 else 128, n)   # lane-dense output stores
    return n              # fall back to full dim (legal, but masked stores)


def conditional_equal_linear(x, labels, weight, bias_weight=None, *,
                             lr_mul=1.0, activation=None, tm=128, tn=256):
    """ConditionalEqualLinear forward.

    x:           [B, in_dim]
    labels:      [B, embed_dim]
    weight:      [out_dim, in_dim]     (PyTorch layout, used as-is)
    bias_weight: [out_dim, embed_dim]  or None
    """
    B, in_dim = x.shape
    out_dim = weight.shape[0]
    scale_w = (1.0 / math.sqrt(in_dim)) * lr_mul

    tm = _pick_tm(B, tm)
    tn = _pick_tn(out_dim, tn)
    grid = (pl.cdiv(B, tm), pl.cdiv(out_dim, tn))

    cparams = pltpu.CompilerParams(
        dimension_semantics=("parallel", "parallel"),
        vmem_limit_bytes=48 * 1024 * 1024,
    )
    # TODO(synk): add a K grid axis with a VMEM f32 accumulator (pl.when init) if
    # in_dim / embed_dim ever grow large enough that a (tn, K) weight block
    # double-buffered no longer fits the VMEM budget.

    if bias_weight is not None:
        embed_dim = labels.shape[1]
        # fold the trailing `* lr_mul` into the bias-path scale (one scalar mul on acc)
        scale_b_lr = (1.0 / math.sqrt(embed_dim)) * lr_mul * lr_mul
        kernel = functools.partial(_cond_equal_linear_kernel,
                                   scale_w=scale_w, scale_b_lr=scale_b_lr,
                                   activation=activation)
        return pl.pallas_call(
            kernel,
            out_shape=jax.ShapeDtypeStruct((B, out_dim), x.dtype),
            grid=grid,
            in_specs=[
                pl.BlockSpec((tm, in_dim), lambda i, j: (i, 0)),
                pl.BlockSpec((tn, in_dim), lambda i, j: (j, 0)),
                pl.BlockSpec((tm, embed_dim), lambda i, j: (i, 0)),
                pl.BlockSpec((tn, embed_dim), lambda i, j: (j, 0)),
            ],
            out_specs=pl.BlockSpec((tm, tn), lambda i, j: (i, j)),
            compiler_params=cparams,
        )(x, weight, labels, bias_weight)
    else:
        kernel = functools.partial(_equal_linear_nobias_kernel,
                                   scale_w=scale_w, activation=activation)
        return pl.pallas_call(
            kernel,
            out_shape=jax.ShapeDtypeStruct((B, out_dim), x.dtype),
            grid=grid,
            in_specs=[
                pl.BlockSpec((tm, in_dim), lambda i, j: (i, 0)),
                pl.BlockSpec((tn, in_dim), lambda i, j: (j, 0)),
            ],
            out_specs=pl.BlockSpec((tm, tn), lambda i, j: (i, j)),
            compiler_params=cparams,
        )(x, weight)


def _reference(x, labels, weight, bias_weight, lr_mul, activation):
    # Mirrors the PyTorch forward (scalar scale distributes over the matmul).
    in_dim = weight.shape[1]
    scale_w = (1.0 / math.sqrt(in_dim)) * lr_mul
    out = jnp.dot(x, weight.T) * scale_w
    if bias_weight is not None:
        embed_dim = bias_weight.shape[1]
        scale_b = (1.0 / math.sqrt(embed_dim)) * lr_mul
        bias = jnp.dot(labels, bias_weight.T) * scale_b
        out = out + bias * lr_mul
    if activation:
        out = jnp.where(out >= 0.0, out, 0.2 * out) * math.sqrt(2.0)
    return out


if __name__ == "__main__":
    key = jax.random.PRNGKey(0)
    k_x, k_l, k_w, k_b = jax.random.split(key, 4)

    batch, in_dim, out_dim, embed_dim = 16, 128, 128, 512
    lr_mul = 0.5

    # Deterministic parameter init matching the module __init__:
    #   weight = randn(out_dim, in_dim) / lr_mul
    #   bias   = randn(out_dim, embed_dim) / lr_mul
    weight = jax.random.normal(k_w, (out_dim, in_dim), dtype=jnp.float32) / lr_mul
    bias_w = jax.random.normal(k_b, (out_dim, embed_dim), dtype=jnp.float32) / lr_mul
    x = jax.random.normal(k_x, (batch, in_dim), dtype=jnp.float32)
    labels = jax.random.normal(k_l, (batch, embed_dim), dtype=jnp.float32)

    # Path 1: conditional bias, no activation
    out1 = jax.block_until_ready(
        conditional_equal_linear(x, labels, weight, bias_w,
                                 lr_mul=lr_mul, activation=None))
    ref1 = _reference(x, labels, weight, bias_w, lr_mul, None)
    assert jnp.allclose(out1, ref1, atol=2e-5, rtol=2e-5)

    # Path 2: conditional bias + fused leaky relu
    out2 = jax.block_until_ready(
        conditional_equal_linear(x, labels, weight, bias_w,
                                 lr_mul=lr_mul, activation="fused_lrelu"))
    ref2 = _reference(x, labels, weight, bias_w, lr_mul, "fused_lrelu")
    assert jnp.allclose(out2, ref2, atol=2e-5, rtol=2e-5)

    # Path 3: bias=False
    out3 = jax.block_until_ready(
        conditional_equal_linear(x, labels, weight, None,
                                 lr_mul=lr_mul, activation=None))
    ref3 = _reference(x, labels, weight, None, lr_mul, None)
    assert jnp.allclose(out3, ref3, atol=2e-5, rtol=2e-5)

    print("KERNEL_OK")
</pallas_src>

<mosaic_0001>
module attributes {stable_mosaic.version = 11 : i64} {
  func.func @_cond_equal_linear_kernel(%arg0: i32, %arg1: i32, %arg2: memref<16x128xf32, #tpu.memory_space<vmem>>, %arg3: memref<128x128xf32, #tpu.memory_space<vmem>>, %arg4: memref<16x512xf32, #tpu.memory_space<vmem>>, %arg5: memref<128x512xf32, #tpu.memory_space<vmem>>, %arg6: memref<16x128xf32, #tpu.memory_space<vmem>>) attributes {dimension_semantics = [#tpu.dimension_semantics<parallel>, #tpu.dimension_semantics<parallel>], iteration_bounds = array<i64: 1, 1>, scalar_prefetch = 0 : i64, scratch_operands = 0 : i64, tpu.core_type = #tpu.core_type<tc>, window_params = [{transform_indices = @transform_0, window_bounds = array<i64: 16, 128>}, {transform_indices = @transform_1, window_bounds = array<i64: 128, 128>}, {transform_indices = @transform_2, window_bounds = array<i64: 16, 512>}, {transform_indices = @transform_3, window_bounds = array<i64: 128, 512>}, {transform_indices = @transform_4, window_bounds = array<i64: 16, 128>}]} {
    %c0 = arith.constant 0 : index
    %c0_0 = arith.constant 0 : index
    %0 = vector.load %arg2[%c0, %c0_0] : memref<16x128xf32, #tpu.memory_space<vmem>>, vector<16x128xf32>
    %c0_1 = arith.constant 0 : index
    %c0_2 = arith.constant 0 : index
    %1 = vector.load %arg3[%c0_1, %c0_2] : memref<128x128xf32, #tpu.memory_space<vmem>>, vector<128x128xf32>
    %cst = arith.constant dense<0.000000e+00> : vector<16x128xf32>
    %2 = tpu.matmul %0, %1, %cst {dimension_numbers = #tpu.dot_dimension_numbers<[1], [1], [0], [0], [0, 0, 1, 0], [], []>} : vector<16x128xf32>, vector<128x128xf32>, vector<16x128xf32> -> vector<16x128xf32>
    %cst_3 = arith.constant 0.0441941731 : f32
    %3 = vector.broadcast %cst_3 : f32 to vector<16x128xf32>
    %4 = arith.mulf %2, %3 : vector<16x128xf32>
    %c0_4 = arith.constant 0 : index
    %c0_5 = arith.constant 0 : index
    %5 = vector.load %arg4[%c0_4, %c0_5] : memref<16x512xf32, #tpu.memory_space<vmem>>, vector<16x512xf32>
    %c0_6 = arith.constant 0 : index
    %c0_7 = arith.constant 0 : index
    %6 = vector.load %arg5[%c0_6, %c0_7] : memref<128x512xf32, #tpu.memory_space<vmem>>, vector<128x512xf32>
    %cst_8 = arith.constant dense<0.000000e+00> : vector<16x128xf32>
    %7 = tpu.matmul %5, %6, %cst_8 {dimension_numbers = #tpu.dot_dimension_numbers<[1], [1], [0], [0], [0, 0, 1, 0], [], []>} : vector<16x512xf32>, vector<128x512xf32>, vector<16x128xf32> -> vector<16x128xf32>
    %cst_9 = arith.constant 0.0110485433 : f32
    %8 = vector.broadcast %cst_9 : f32 to vector<16x128xf32>
    %9 = arith.mulf %7, %8 : vector<16x128xf32>
    %10 = arith.addf %4, %9 : vector<16x128xf32>
    %c0_10 = arith.constant 0 : index
    %c0_11 = arith.constant 0 : index
    %11 = vector.load %arg6[%c0_10, %c0_11] : memref<16x128xf32, #tpu.memory_space<vmem>>, vector<16x128xf32>
    tpu.vector_store %arg6[%c0_10, %c0_11], %10 {strides = array<i32>} : memref<16x128xf32, #tpu.memory_space<vmem>>, vector<16x128xf32>,
    return
  }
  func.func @transform_0(%arg0: i32, %arg1: i32) -> (i32, i32) {
    %c0_i32 = arith.constant 0 : i32
    %c0_i32_0 = arith.constant 0 : i32
    return %arg0, %c0_i32 : i32, i32
  }
  func.func @transform_1(%arg0: i32, %arg1: i32) -> (i32, i32) {
    %c0_i32 = arith.constant 0 : i32
    %c0_i32_0 = arith.constant 0 : i32
    return %arg1, %c0_i32 : i32, i32
  }
  func.func @transform_2(%arg0: i32, %arg1: i32) -> (i32, i32) {
    %c0_i32 = arith.constant 0 : i32
    %c0_i32_0 = arith.constant 0 : i32
    return %arg0, %c0_i32 : i32, i32
  }
  func.func @transform_3(%arg0: i32, %arg1: i32) -> (i32, i32) {
    %c0_i32 = arith.constant 0 : i32
    %c0_i32_0 = arith.constant 0 : i32
    return %arg1, %c0_i32 : i32, i32
  }
  func.func @transform_4(%arg0: i32, %arg1: i32) -> (i32, i32) {
    %c0_i32 = arith.constant 0 : i32
    return %arg0, %arg1 : i32, i32
  }
}

</mosaic_0001>

<bundles_post_ra>
// kernel: tpu_custom_call.1
= control target key start
LH: loop header
LB: loop body
LE: loop exit
PB: predicated region body
PF: predicated region fallthrough
CT: control target
= control target key end

     0   :  { %9 = vsyncpa [#allocation3], 0  ;;  %s526_s0 = inlined_call_operand.hbm [shape: f32[16,128], index: 0, kind: input, shape index: {}]   ;;  %s527_s1 = inlined_call_operand.hbm [shape: f32[128,128], index: 1, kind: input, shape index: {}]   ;;  %s528_s2 = inlined_call_operand.hbm [shape: f32[16,512], index: 2, kind: input, shape index: {}]   ;;  %s529_s3 = inlined_call_operand.hbm [shape: f32[128,512], index: 3, kind: input, shape index: {}]   ;;  %s530_s4 = inlined_call_operand.hbm [shape: f32[16,128], index: 4, kind: output, shape index: {}]  }
   0x1   :  { %10 = vsyncpa [#allocation6], 0 }
   0x2   :  { %11 = vsyncpa [#allocation9], 0 }
   0x3   :  { %12 = vsyncpa [#allocation4], 0  ;;  %s30_s17 = sshll.u32 %s527_s1, 4  ;;  %s468_s18 = smov [#allocation5]   ;;  %s31_s17 = int_to_ptr.hbm [resolvable:$true] %s30_s17 }
   0x4   :  { %s32_s19 = sshll.u32 %s468_s18, 4  ;;  %s17_s22 = sshll.u32 %s526_s0, 4  ;;  %s33_s19 = int_to_ptr.vmem [resolvable:$true] %s32_s19  ;;  %s18_s22 = int_to_ptr.hbm [resolvable:$true] %s17_s22 }
   0x5   :  { %s469_s23 = smov 128   ;;  %s470_s24 = smov 8  }
   0x6   :  { %38 = dma.hbm_to_vmem [thread:$0]  %s31_s17, 2048, %s33_s19, [#allocation6], %s469_s23, %s469_s23, %s470_s24  }
   0x7   :  { %s471_s25 = smov [#allocation2]   ;;  %s43_s1 = sshll.u32 %s528_s2, 4  ;;  %s44_s1 = int_to_ptr.hbm [resolvable:$true] %s43_s1 }
   0x8   :  { %s19_s26 = sshll.u32 %s471_s25, 4  ;;  %s472_s0 = smov [#allocation7]   ;;  %s20_s26 = int_to_ptr.vmem [resolvable:$true] %s19_s26 }
   0x9   :  { %25 = dma.hbm_to_vmem [thread:$0]  %s18_s22, 256, %s20_s26, [#allocation3], %s469_s23, %s469_s23, %s470_s24  }
   0xa   :  { %s45_s29 = sshll.u32 %s472_s0, 4  ;;  %s56_s6 = sshll.u32 %s529_s3, 4  ;;  %s46_s29 = int_to_ptr.vmem [resolvable:$true] %s45_s29  ;;  %s57_s6 = int_to_ptr.hbm [resolvable:$true] %s56_s6 }
   0xb   :  { %s473_s7 = smov 512   ;;  %s474_s8 = smov 32  }
   0xc   :  { %51 = dma.hbm_to_vmem [thread:$0]  %s44_s1, 1024, %s46_s29, [#allocation6], %s473_s7, %s473_s7, %s474_s8  }
   0xd   :  { %s475_s9 = smov [#allocation8]  }
   0xe   :  { %s58_s10 = sshll.u32 %s475_s9, 4  ;;  %s59_s10 = int_to_ptr.vmem [resolvable:$true] %s58_s10 }
   0xf   :  { %64 = dma.hbm_to_vmem [thread:$0]  %s57_s6, 8192, %s59_s10, [#allocation9], %s473_s7, %s473_s7, %s474_s8  }
  0x10   :  { %460 = dma.done.wait [#allocation3], 256  }
  0x11   :  { %461 = vsyncadd [#allocation3], 4294967040 }
  0x12   :  { %462 = dma.done.wait [#allocation6], 3072  }
  0x13   :  { %463 = vsyncadd [#allocation6], 4294964224 }
  0x14   :  { %464 = dma.done.wait [#allocation9], 8192  }
  0x15   :  { %465 = vsyncadd [#allocation9], 4294959104  ;;  %v98_v0 = vld [vmem:[#allocation5 + $0x78] sm:$0xff]  ;;  %v192_v1 = vld [vmem:[#allocation8 + $0x1e0] sm:$0xff]  ;;  %s476_s2 = smov [#allocation10]   ;;  %s300_s13 = sshll.u32 %s530_s4, 4  ;;  %s301_s13 = int_to_ptr.hbm [resolvable:$true] %s300_s13 }
  0x16   :  { %99 = vmatpush.xpose.msra.mxu0 %v98_v0  ;;  %196 = vmatpush.xpose.msra.mxu1 %v192_v1  ;;  %v97_v2 = vld [vmem:[#allocation5 + $0x70] sm:$0xff]  ;;  %v188_v3 = vld [vmem:[#allocation8 + $0x1c0] sm:$0xff]  ;;  %v96_v4 = vld [vmem:[#allocation5 + $0x68] sm:$0xff]  ;;  %s298_s3 = sshll.u32 %s476_s2, 4  ;;  %s299_s3 = int_to_ptr.vmem [resolvable:$true] %s298_s3 }
  0x17   :  { %v184_v5 = vld [vmem:[#allocation8 + $0x1a0] sm:$0xff]  ;;  %v193_v6 = vld [vmem:[#allocation8 + $0x1e8] sm:$0xff]  ;;  %v194_v7 = vld [vmem:[#allocation8 + $0x1f0] sm:$0xff] }
  0x18   :  { %219 = vmatpush.xpose.msra.mxu2 %v193_v6  ;;  %v189_v8 = vld [vmem:[#allocation8 + $0x1c8] sm:$0xff]  ;;  %v95_v9 = vld [vmem:[#allocation5 + $0x60] sm:$0xff]  ;;  %242 = vmatpush.xpose.msra.mxu3 %v194_v7  ;;  %v190_v11 = vld [vmem:[#allocation8 + $0x1d0] sm:$0xff] }
  0x19   :  { %v180_v10 = vld [vmem:[#allocation8 + $0x180] sm:$0xff]  ;;  %v185_v12 = vld [vmem:[#allocation8 + $0x1a8] sm:$0xff]  ;;  %v94_v13 = vld [vmem:[#allocation5 + $0x58] sm:$0xff] }
  0x1a   :  { %100 = vmatpush.xpose.msra.mxu0 %v97_v2  ;;  %197 = vmatpush.xpose.msra.mxu1 %v188_v3  ;;  %v176_v14 = vld [vmem:[#allocation8 + $0x160] sm:$0xff]  ;;  %v186_v15 = vld [vmem:[#allocation8 + $0x1b0] sm:$0xff]  ;;  %v181_v16 = vld [vmem:[#allocation8 + $0x188] sm:$0xff] }
  0x1b   :  { %v93_v17 = vld [vmem:[#allocation5 + $0x50] sm:$0xff]  ;;  %v172_v18 = vld [vmem:[#allocation8 + $0x140] sm:$0xff]  ;;  %v177_v20 = vld [vmem:[#allocation8 + $0x168] sm:$0xff] }
  0x1c   :  { %220 = vmatpush.xpose.msra.mxu2 %v189_v8  ;;  %243 = vmatpush.xpose.msra.mxu3 %v190_v11  ;;  %v182_v19 = vld [vmem:[#allocation8 + $0x190] sm:$0xff]  ;;  %v92_v21 = vld [vmem:[#allocation5 + $0x48] sm:$0xff]  ;;  %v168_v22 = vld [vmem:[#allocation8 + $0x120] sm:$0xff] }
  0x1d   :  { %v178_v23 = vld [vmem:[#allocation8 + $0x170] sm:$0xff]  ;;  %v173_v24 = vld [vmem:[#allocation8 + $0x148] sm:$0xff]  ;;  %v91_v25 = vld [vmem:[#allocation5 + $0x40] sm:$0xff] }
  0x1e   :  { %101 = vmatpush.xpose.msra.mxu0 %v96_v4  ;;  %198 = vmatpush.xpose.msra.mxu1 %v184_v5  ;;  %v164_v26 = vld [vmem:[#allocation8 + $0x100] sm:$0xff]  ;;  %v174_v27 = vld [vmem:[#allocation8 + $0x150] sm:$0xff]  ;;  %v90_v28 = vld [vmem:[#allocation5 + $0x38] sm:$0xff] }
  0x1f   :  { %v160_v29 = vld [vmem:[#allocation8 + $0xe0] sm:$0xff]  ;;  %v169_v30 = vld [vmem:[#allocation8 + $0x128] sm:$0xff]  ;;  %v170_v31 = vld [vmem:[#allocation8 + $0x130] sm:$0xff] }
  0x20   :  { %221 = vmatpush.xpose.msra.mxu2 %v185_v12  ;;  %244 = vmatpush.xpose.msra.mxu3 %v186_v15  ;;  %v89_v32 = vld [vmem:[#allocation5 + $0x30] sm:$0xff]  ;;  %v156_v33 = vld [vmem:[#allocation8 + $0xc0] sm:$0xff]  ;;  %v165_v34 = vld [vmem:[#allocation8 + $0x108] sm:$0xff] }
  0x21   :  { %v166_v35 = vld [vmem:[#allocation8 + $0x110] sm:$0xff]  ;;  %v88_v36 = vld [vmem:[#allocation5 + $0x28] sm:$0xff]  ;;  %v152_v37 = vld [vmem:[#allocation8 + $0xa0] sm:$0xff] }
  0x22   :  { %102 = vmatpush.xpose.msra.mxu0 %v95_v9  ;;  %199 = vmatpush.xpose.msra.mxu1 %v180_v10  ;;  %v161_v38 = vld [vmem:[#allocation8 + $0xe8] sm:$0xff]  ;;  %v162_v39 = vld [vmem:[#allocation8 + $0xf0] sm:$0xff]  ;;  %v87_v40 = vld [vmem:[#allocation5 + $0x20] sm:$0xff] }
  0x23   :  { %v148_v41 = vld [vmem:[#allocation8 + $0x80] sm:$0xff]  ;;  %v157_v42 = vld [vmem:[#allocation8 + $0xc8] sm:$0xff]  ;;  %v158_v43 = vld [vmem:[#allocation8 + $0xd0] sm:$0xff] }
  0x24   :  { %222 = vmatpush.xpose.msra.mxu2 %v181_v16  ;;  %245 = vmatpush.xpose.msra.mxu3 %v182_v19  ;;  %v86_v44 = vld [vmem:[#allocation5 + $0x18] sm:$0xff]  ;;  %v144_v45 = vld [vmem:[#allocation8 + $0x60] sm:$0xff]  ;;  %v153_v46 = vld [vmem:[#allocation8 + $0xa8] sm:$0xff] }
  0x25   :  { %v154_v47 = vld [vmem:[#allocation8 + $0xb0] sm:$0xff]  ;;  %v140_v49 = vld [vmem:[#allocation8 + $0x40] sm:$0xff]  ;;  %v149_v50 = vld [vmem:[#allocation8 + $0x88] sm:$0xff] }
  0x26   :  { %103 = vmatpush.xpose.msra.mxu0 %v94_v13  ;;  %200 = vmatpush.xpose.msra.mxu1 %v176_v14  ;;  %v85_v48 = vld [vmem:[#allocation5 + $0x10] sm:$0xff]  ;;  %v84_v52 = vld [vmem:[#allocation5 + $0x8] sm:$0xff]  ;;  %v136_v53 = vld [vmem:[#allocation8 + $0x20] sm:$0xff] }
  0x27   :  { %v150_v51 = vld [vmem:[#allocation8 + $0x90] sm:$0xff]  ;;  %v145_v54 = vld [vmem:[#allocation8 + $0x68] sm:$0xff]  ;;  %v83_v56 = vld [vmem:[#allocation5] sm:$0xff] }
  0x28   :  { %223 = vmatpush.xpose.msra.mxu2 %v177_v20  ;;  %246 = vmatpush.xpose.msra.mxu3 %v178_v23  ;;  %v146_v55 = vld [vmem:[#allocation8 + $0x70] sm:$0xff]  ;;  %v132_v57 = vld [vmem:[#allocation8] sm:$0xff]  ;;  %v141_v58 = vld [vmem:[#allocation8 + $0x48] sm:$0xff] }
  0x29   :  { %v195_v59 = vld [vmem:[#allocation8 + $0x1f8] sm:$0xff]  ;;  %v142_v60 = vld [vmem:[#allocation8 + $0x50] sm:$0xff]  ;;  %v137_v61 = vld [vmem:[#allocation8 + $0x28] sm:$0xff] }
  0x2a   :  { %104 = vmatpush.xpose.msra.mxu0 %v93_v17  ;;  %201 = vmatpush.xpose.msra.mxu1 %v172_v18  ;;  %v191_v62 = vld [vmem:[#allocation8 + $0x1d8] sm:$0xff]  ;;  %v138_v63 = vld [vmem:[#allocation8 + $0x30] sm:$0xff]  ;;  %v133_v0 = vld [vmem:[#allocation8 + $0x8] sm:$0xff] }
  0x2b   :  { %v187_v1 = vld [vmem:[#allocation8 + $0x1b8] sm:$0xff]  ;;  %v134_v2 = vld [vmem:[#allocation8 + $0x10] sm:$0xff]  ;;  %v125_v3 = vld [vmem:[#allocation7 + $0x8] sm:$0xff] }
  0x2c   :  { %224 = vmatpush.xpose.msra.mxu2 %v173_v24  ;;  %247 = vmatpush.xpose.msra.mxu3 %v174_v27  ;;  %v183_v4 = vld [vmem:[#allocation8 + $0x198] sm:$0xff]  ;;  %v126_v5 = vld [vmem:[#allocation7 + $0x10] sm:$0xff]  ;;  %v124_v7 = vld [vmem:[#allocation7] sm:$0xff] }
  0x2d   :  { %v81_v6 = vld [vmem:[#allocation2] sm:$0xff]  ;;  %v179_v8 = vld [vmem:[#allocation8 + $0x178] sm:$0xff]  ;;  %v129_v9 = vld [vmem:[#allocation7 + $0x28] sm:$0xff] }
  0x2e   :  { %105 = vmatpush.xpose.msra.mxu0 %v92_v21  ;;  %202 = vmatpush.xpose.msra.mxu1 %v168_v22  ;;  %v175_v10 = vld [vmem:[#allocation8 + $0x158] sm:$0xff]  ;;  %v130_v11 = vld [vmem:[#allocation7 + $0x30] sm:$0xff]  ;;  %v128_v13 = vld [vmem:[#allocation7 + $0x20] sm:$0xff] }
  0x2f   :  { %v82_v12 = vld [vmem:[#allocation2 + $0x8] sm:$0xff] }
  0x30   :  { %225 = vmatpush.xpose.msra.mxu2 %v169_v30  ;;  %248 = vmatpush.xpose.msra.mxu3 %v170_v31  ;;  %v171_v14 = vld [vmem:[#allocation8 + $0x138] sm:$0xff] }
  0x31   :  { %v167_v15 = vld [vmem:[#allocation8 + $0x118] sm:$0xff] }
  0x32   :  { %106 = vmatpush.xpose.msra.mxu0 %v91_v25  ;;  %203 = vmatpush.xpose.msra.mxu1 %v164_v26  ;;  %v163_v16 = vld [vmem:[#allocation8 + $0xf8] sm:$0xff] }
  0x33   :  { %v159_v17 = vld [vmem:[#allocation8 + $0xd8] sm:$0xff] }
  0x34   :  { %226 = vmatpush.xpose.msra.mxu2 %v165_v34  ;;  %249 = vmatpush.xpose.msra.mxu3 %v166_v35  ;;  %v155_v18 = vld [vmem:[#allocation8 + $0xb8] sm:$0xff] }
  0x35   :  { %v151_v19 = vld [vmem:[#allocation8 + $0x98] sm:$0xff] }
  0x36   :  { %107 = vmatpush.xpose.msra.mxu0 %v90_v28  ;;  %204 = vmatpush.xpose.msra.mxu1 %v160_v29  ;;  %v147_v20 = vld [vmem:[#allocation8 + $0x78] sm:$0xff] }
  0x37   :  { %v143_v21 = vld [vmem:[#allocation8 + $0x58] sm:$0xff] }
  0x38   :  { %227 = vmatpush.xpose.msra.mxu2 %v161_v38  ;;  %250 = vmatpush.xpose.msra.mxu3 %v162_v39  ;;  %v139_v22 = vld [vmem:[#allocation8 + $0x38] sm:$0xff] }
  0x39   :  { %v135_v23 = vld [vmem:[#allocation8 + $0x18] sm:$0xff] }
  0x3a   :  { %108 = vmatpush.xpose.msra.mxu0 %v89_v32  ;;  %205 = vmatpush.xpose.msra.mxu1 %v156_v33  ;;  %v127_v24 = vld [vmem:[#allocation7 + $0x18] sm:$0xff] }
  0x3b   :  { %v131_v25 = vld [vmem:[#allocation7 + $0x38] sm:$0xff] }
  0x3c   :  { %228 = vmatpush.xpose.msra.mxu2 %v157_v42  ;;  %251 = vmatpush.xpose.msra.mxu3 %v158_v43 }
  0x3e   :  { %109 = vmatpush.xpose.msra.mxu0 %v88_v36  ;;  %206 = vmatpush.xpose.msra.mxu1 %v152_v37 }
  0x40   :  { %229 = vmatpush.xpose.msra.mxu2 %v153_v46  ;;  %252 = vmatpush.xpose.msra.mxu3 %v154_v47 }
  0x42   :  { %110 = vmatpush.xpose.msra.mxu0 %v87_v40  ;;  %207 = vmatpush.xpose.msra.mxu1 %v148_v41 }
  0x44   :  { %230 = vmatpush.xpose.msra.mxu2 %v149_v50  ;;  %253 = vmatpush.xpose.msra.mxu3 %v150_v51 }
  0x46   :  { %111 = vmatpush.xpose.msra.mxu0 %v86_v44  ;;  %208 = vmatpush.xpose.msra.mxu1 %v144_v45 }
  0x48   :  { %231 = vmatpush.xpose.msra.mxu2 %v145_v54  ;;  %254 = vmatpush.xpose.msra.mxu3 %v146_v55 }
  0x4a   :  { %112 = vmatpush.xpose.msra.mxu0 %v85_v48  ;;  %209 = vmatpush.xpose.msra.mxu1 %v140_v49 }
  0x4c   :  { %232 = vmatpush.xpose.msra.mxu2 %v141_v58  ;;  %255 = vmatpush.xpose.msra.mxu3 %v142_v60 }
  0x4e   :  { %113 = vmatpush.xpose.msra.mxu0 %v84_v52  ;;  %210 = vmatpush.xpose.msra.mxu1 %v136_v53 }
  0x50   :  { %233 = vmatpush.xpose.msra.mxu2 %v137_v61  ;;  %256 = vmatpush.xpose.msra.mxu3 %v138_v63 }
  0x52   :  { %114 = vmatpush.xpose.msra.mxu0 %v83_v56  ;;  %211 = vmatpush.xpose.msra.mxu1 %v132_v57 }
  0x54   :  { %234 = vmatpush.xpose.msra.mxu2 %v133_v0  ;;  %257 = vmatpush.xpose.msra.mxu3 %v134_v2 }
  0x55   :  { %115 = vmatmul.f32.vlgmr.msra.gmra.mxu0 %v81_v6  ;;  %212 = vmatmul.f32.vlgmr.msra.gmra.mxu1 %v124_v7 }
  0x56   :  { %265 = vmatpush.xpose.msrb.mxu0 %v195_v59  ;;  %315 = vmatpush.xpose.msrb.mxu1 %v195_v59 }
  0x57   :  { %235 = vmatmul.f32.vlgmr.msra.gmra.mxu2 %v125_v3  ;;  %258 = vmatmul.f32.vlgmr.msra.gmra.mxu3 %v126_v5 }
  0x5a   :  { %266 = vmatpush.xpose.msrb.mxu0 %v191_v62  ;;  %316 = vmatpush.xpose.msrb.mxu1 %v191_v62 }
  0x5d   :  { %118 = vmatmul.f32.gmra.mxu0 %v82_v12  ;;  %215 = vmatmul.f32.gmra.mxu1 %v128_v13 }
  0x5e   :  { %267 = vmatpush.xpose.msrb.mxu0 %v187_v1  ;;  %317 = vmatpush.xpose.msrb.mxu1 %v187_v1 }
  0x5f   :  { %238 = vmatmul.f32.gmra.mxu2 %v129_v9  ;;  %261 = vmatmul.f32.gmra.mxu3 %v130_v11 }
  0x62   :  { %268 = vmatpush.xpose.msrb.mxu0 %v183_v4  ;;  %318 = vmatpush.xpose.msrb.mxu1 %v183_v4 }
  0x66   :  { %269 = vmatpush.xpose.msrb.mxu0 %v179_v8  ;;  %319 = vmatpush.xpose.msrb.mxu1 %v179_v8 }
  0x6a   :  { %270 = vmatpush.xpose.msrb.mxu0 %v175_v10  ;;  %320 = vmatpush.xpose.msrb.mxu1 %v175_v10 }
  0x6e   :  { %271 = vmatpush.xpose.msrb.mxu0 %v171_v14  ;;  %321 = vmatpush.xpose.msrb.mxu1 %v171_v14 }
  0x72   :  { %272 = vmatpush.xpose.msrb.mxu0 %v167_v15  ;;  %322 = vmatpush.xpose.msrb.mxu1 %v167_v15 }
  0x76   :  { %273 = vmatpush.xpose.msrb.mxu0 %v163_v16  ;;  %323 = vmatpush.xpose.msrb.mxu1 %v163_v16 }
  0x7a   :  { %274 = vmatpush.xpose.msrb.mxu0 %v159_v17  ;;  %324 = vmatpush.xpose.msrb.mxu1 %v159_v17 }
  0x7e   :  { %275 = vmatpush.xpose.msrb.mxu0 %v155_v18  ;;  %325 = vmatpush.xpose.msrb.mxu1 %v155_v18 }
  0x82   :  { %276 = vmatpush.xpose.msrb.mxu0 %v151_v19  ;;  %326 = vmatpush.xpose.msrb.mxu1 %v151_v19 }
  0x86   :  { %277 = vmatpush.xpose.msrb.mxu0 %v147_v20  ;;  %327 = vmatpush.xpose.msrb.mxu1 %v147_v20 }
  0x8a   :  { %278 = vmatpush.xpose.msrb.mxu0 %v143_v21  ;;  %328 = vmatpush.xpose.msrb.mxu1 %v143_v21 }
  0x8e   :  { %279 = vmatpush.xpose.msrb.mxu0 %v139_v22  ;;  %329 = vmatpush.xpose.msrb.mxu1 %v139_v22 }
  0x92   :  { %280 = vmatpush.xpose.msrb.mxu0 %v135_v23  ;;  %330 = vmatpush.xpose.msrb.mxu1 %v135_v23 }
  0x95   :  { %281 = vmatmul.f32.vlgmr.msrb.gmra.mxu0 %v127_v24  ;;  %284 = vmatmul.f32.vlgmr.msrb.gmra.mxu1 %v131_v25 }
  0xd2   :  { %v116_v26 = vpop.f32.mrf.mxu0  ;;  %v213_v27 = vpop.f32.mrf.mxu1 }
  0xd3   :  { %v122_v42 = vmul.f32 0.044194173, %v116_v26 }
  0xda   :  { %v236_v28 = vpop.f32.mrf.mxu2  ;;  %v259_v29 = vpop.f32.mrf.mxu3 }
  0xdb   :  { %v119_v30 = vpop.f32.mrf.mxu0  ;;  %v216_v31 = vpop.f32.mrf.mxu1  ;;  %v237_v33 = vadd.f32 %v236_v28, %v213_v27 }
  0xdc   :  { %v123_v43 = vmul.f32 0.044194173, %v119_v30 }
  0xdd   :  { %v260_v36 = vadd.f32 %v259_v29, %v237_v33 }
  0xe2   :  { %v239_v32 = vpop.f32.mrf.mxu2  ;;  %v262_v35 = vpop.f32.mrf.mxu3 }
  0xe3   :  { %v240_v34 = vadd.f32 %v239_v32, %v216_v31 }
  0xe5   :  { %v263_v37 = vadd.f32 %v262_v35, %v240_v34 }
 0x112   :  { %v282_v38 = vpop.f32.mrf.mxu0  ;;  %v285_v39 = vpop.f32.mrf.mxu1 }
 0x113   :  { %v283_v40 = vadd.f32 %v282_v38, %v260_v36  ;;  %v286_v41 = vadd.f32 %v285_v39, %v263_v37 }
 0x115   :  { %v288_v44 = vmul.f32 0.011048543, %v283_v40  ;;  %v289_v45 = vmul.f32 0.011048543, %v286_v41 }
 0x117   :  { %v290_v46 = vadd.f32 %v288_v44, %v122_v42  ;;  %v291_v47 = vadd.f32 %v289_v45, %v123_v43 }
 0x119   :  { %292 = vst [vmem:[#allocation10] sm:$0xff] %v290_v46 }
 0x11a   :  { %293 = vst [vmem:[#allocation10 + $0x8] sm:$0xff] %v291_v47 }
 0x11b   :  { %306 = dma.vmem_to_hbm [thread:$0]  %s299_s3, 256, %s301_s13, [#allocation4], %s469_s23, %s469_s23, %s470_s24  }
 0x11c   :  { %466 = dma.done.wait [#allocation4], 256  }
 0x11d   :  { %467 = vsyncadd [#allocation4], 4294967040 }
 0x11e   :  { %311 = vsyncpa [#allocation3], 1 }
 0x11f   :  { %312 = vsyncpa [#allocation6], 1 }
 0x120   :  { %313 = vsyncpa [#allocation9], 1 }
 0x121   :  { %314 = vsyncpa [#allocation4], 1 }

</bundles_post_ra>
